<compile_context>
chip_gen: v5e
topology: v5e:2x2
jax: 0.10.0
libtpu: 0.0.40
codegen_flags: <defaults>
</compile_context>

<pallas_src>
import functools
import math

import jax
import jax.numpy as jnp
from jax.experimental import pallas as pl
from jax.experimental.pallas import tpu as pltpu


_LANE = 128
_VMEM_LIMIT_BYTES = 48 * 1024 * 1024       # headroom under v7x's 64 MiB physical VMEM
_RESIDENT_SUPPORT_BYTES = 8 * 1024 * 1024  # keep support VMEM-resident below this


def _round_up(x, m):
    return (x + m - 1) // m * m


def _pad2d(a, rows, cols):
    r, c = a.shape
    if r == rows and c == cols:
        return a
    return jnp.pad(a, ((0, rows - r), (0, cols - c)))


# --------------------------------------------------------------------------- kernel 1
def _support_kernel(x_ref, w_ref, s_ref):
    # support tile = X[i] @ W   (MXU, f32 accumulation), stored in the compute dtype.
    s_ref[...] = jnp.dot(
        x_ref[...], w_ref[...], preferred_element_type=jnp.float32
    ).astype(s_ref.dtype)


# --------------------------------------------------------------------------- kernel 2
def _aggregate_kernel(adj_ref, s_ref, b_ref, o_ref, acc_ref, *, tile_k, resident):
    k = pl.program_id(1)

    @pl.when(k == 0)
    def _():
        acc_ref[...] = jnp.zeros_like(acc_ref)

    if resident:
        # Whole (padded) support lives in VMEM; slice out the current k tile.
        start = pl.multiple_of(k * tile_k, tile_k)
        s_tile = s_ref[pl.ds(start, tile_k), :]
    else:
        s_tile = s_ref[...]

    acc_ref[...] += jnp.dot(adj_ref[...], s_tile, preferred_element_type=jnp.float32)

    @pl.when(k == pl.num_programs(1) - 1)
    def _():
        # Bias added exactly once, in f32, then cast to the output dtype.
        o_ref[...] = (acc_ref[...] + b_ref[...]).astype(o_ref.dtype)


# --------------------------------------------------------------------------- wrapper
def graph_convolution(x, adj, weight, bias=None, *,
                      compute_dtype=jnp.bfloat16,
                      tile_m=256, tile_k=256,
                      support_resident=None):
    """GCN layer forward: adj @ (x @ weight) + bias.

    x      : [N, F_in]    node features
    adj    : [N, N]       dense (normalized) adjacency
    weight : [F_in, F_out]
    bias   : [F_out] or None
    """
    N, F_in = x.shape
    F_out = weight.shape[1]
    out_dtype = x.dtype

    # Padded problem sizes: rows to a multiple of both tile edges, lanes to 128.
    n_pad = _round_up(N, math.lcm(tile_m, tile_k))
    f_out_pad = _round_up(F_out, _LANE)
    num_i = n_pad // tile_m
    num_k = n_pad // tile_k

    itemsize = jnp.dtype(compute_dtype).itemsize
    if support_resident is None:
        support_resident = n_pad * f_out_pad * itemsize <= _RESIDENT_SUPPORT_BYTES

    x_p = _pad2d(x, n_pad, F_in).astype(compute_dtype)
    adj_p = _pad2d(adj, n_pad, n_pad).astype(compute_dtype)
    w_p = _pad2d(weight, F_in, f_out_pad).astype(compute_dtype)
    if bias is None:
        # bias=None: finalize adds a zero vector (negligible cost, exact result).
        b_p = jnp.zeros((1, f_out_pad), dtype=jnp.float32)
    else:
        b_p = _pad2d(bias.reshape(1, F_out), 1, f_out_pad).astype(jnp.float32)

    # ---- pass 1: support = X @ W, computed exactly once ------------------------------
    support = pl.pallas_call(
        _support_kernel,
        out_shape=jax.ShapeDtypeStruct((n_pad, f_out_pad), compute_dtype),
        grid=(num_i,),
        in_specs=[
            pl.BlockSpec((tile_m, F_in), lambda i: (i, 0)),
            pl.BlockSpec((F_in, f_out_pad), lambda i: (0, 0)),
        ],
        out_specs=pl.BlockSpec((tile_m, f_out_pad), lambda i: (i, 0)),
        compiler_params=pltpu.CompilerParams(
            dimension_semantics=("parallel",),
            vmem_limit_bytes=_VMEM_LIMIT_BYTES,
        ),
        cost_estimate=pl.CostEstimate(
            flops=2 * n_pad * F_in * f_out_pad,
            transcendentals=0,
            bytes_accessed=(n_pad * F_in + F_in * f_out_pad + n_pad * f_out_pad)
            * itemsize,
        ),
    )(x_p, w_p)

    # ---- pass 2: out = adj @ support + bias  (tiled reduction over k) -----------------
    if support_resident:
        support_spec = pl.BlockSpec((n_pad, f_out_pad), lambda i, k: (0, 0))
    else:
        support_spec = pl.BlockSpec((tile_k, f_out_pad), lambda i, k: (k, 0))

    out_p = pl.pallas_call(
        functools.partial(_aggregate_kernel, tile_k=tile_k, resident=support_resident),
        out_shape=jax.ShapeDtypeStruct((n_pad, f_out_pad), out_dtype),
        grid=(num_i, num_k),
        in_specs=[
            pl.BlockSpec((tile_m, tile_k), lambda i, k: (i, k)),  # adj tile (bf16)
            support_spec,                                          # support
            pl.BlockSpec((1, f_out_pad), lambda i, k: (0, 0)),     # bias (f32)
        ],
        out_specs=pl.BlockSpec((tile_m, f_out_pad), lambda i, k: (i, 0)),
        scratch_shapes=[pltpu.VMEM((tile_m, f_out_pad), jnp.float32)],
        compiler_params=pltpu.CompilerParams(
            dimension_semantics=("parallel", "arbitrary"),
            vmem_limit_bytes=_VMEM_LIMIT_BYTES,
        ),
        cost_estimate=pl.CostEstimate(
            flops=2 * n_pad * n_pad * f_out_pad,
            transcendentals=0,
            bytes_accessed=n_pad * n_pad * itemsize
            + n_pad * f_out_pad * itemsize
            + n_pad * f_out_pad * jnp.dtype(out_dtype).itemsize,
        ),
    )(adj_p, support, b_p)

    # TODO(synk): for genuinely sparse graphs, skip all-zero adjacency tiles via a
    # scalar-prefetched block-nonzero mask (PrefetchScalarGridSpec + pl.when).
    return out_p[:N, :F_out]


if __name__ == "__main__":
    # Small shapes that still exercise padding (N, F_out not tile-aligned) and a 2-D grid.
    N, F_in, F_out = 520, 48, 80

    key = jax.random.PRNGKey(0)
    k_x, k_adj, k_w, k_b = jax.random.split(key, 4)

    # Node features.
    x = jax.random.normal(k_x, (N, F_in), dtype=jnp.float32)

    # Dense symmetric row-normalized "adjacency" (torch.spmm with dense semantics).
    a_raw = (jax.random.uniform(k_adj, (N, N)) > 0.8).astype(jnp.float32)
    a_sym = jnp.maximum(a_raw, a_raw.T) + jnp.eye(N, dtype=jnp.float32)
    adj = a_sym / jnp.sum(a_sym, axis=1, keepdims=True)

    # Parameters matching GraphConvolution.reset_parameters(): uniform(-stdv, stdv).
    stdv = 1.0 / math.sqrt(F_out)
    weight = jax.random.uniform(k_w, (F_in, F_out), minval=-stdv, maxval=stdv,
                                dtype=jnp.float32)
    bias = jax.random.uniform(k_b, (F_out,), minval=-stdv, maxval=stdv,
                              dtype=jnp.float32)

    # High-precision f32 reference.
    ref = (jnp.dot(adj,
                   jnp.dot(x, weight, precision=jax.lax.Precision.HIGHEST),
                   precision=jax.lax.Precision.HIGHEST)
           + bias[None, :])

    # Default path: bf16 matmul inputs, f32 accumulation, support VMEM-resident.
    out = jax.block_until_ready(graph_convolution(x, adj, weight, bias))
    assert out.shape == (N, F_out) and out.dtype == x.dtype
    assert jnp.allclose(out, ref, atol=3e-2, rtol=3e-2)

    # Streaming-support path (what large N would use when support exceeds the VMEM budget).
    out_s = jax.block_until_ready(
        graph_convolution(x, adj, weight, bias, support_resident=False))
    assert jnp.allclose(out_s, ref, atol=3e-2, rtol=3e-2)

    # Full-f32 compute path with smaller tiles (exercises a 5x5 grid + accumulation logic).
    out_f32 = jax.block_until_ready(
        graph_convolution(x, adj, weight, bias,
                          compute_dtype=jnp.float32, tile_m=128, tile_k=128))
    assert jnp.allclose(out_f32, ref, atol=3e-2, rtol=3e-2)

    print("KERNEL_OK")
</pallas_src>

<mosaic_0001>
module attributes {stable_mosaic.version = 11 : i64} {
  func.func @_support_kernel(%arg0: i32, %arg1: memref<256x48xbf16, #tpu.memory_space<vmem>>, %arg2: memref<48x128xbf16, #tpu.memory_space<vmem>>, %arg3: memref<256x128xbf16, #tpu.memory_space<vmem>>) attributes {dimension_semantics = [#tpu.dimension_semantics<parallel>], iteration_bounds = array<i64: 3>, scalar_prefetch = 0 : i64, scratch_operands = 0 : i64, tpu.core_type = #tpu.core_type<tc>, window_params = [{transform_indices = @transform_0, window_bounds = array<i64: 256, 48>}, {pipeline_mode = #tpu.pipeline_mode<synchronous>, transform_indices = @transform_1, window_bounds = array<i64: 48, 128>}, {transform_indices = @transform_2, window_bounds = array<i64: 256, 128>}]} {
    %c0 = arith.constant 0 : index
    %c0_0 = arith.constant 0 : index
    %0 = vector.load %arg1[%c0, %c0_0] : memref<256x48xbf16, #tpu.memory_space<vmem>>, vector<256x48xbf16>
    %c0_1 = arith.constant 0 : index
    %c0_2 = arith.constant 0 : index
    %1 = vector.load %arg2[%c0_1, %c0_2] : memref<48x128xbf16, #tpu.memory_space<vmem>>, vector<48x128xbf16>
    %cst = arith.constant dense<0.000000e+00> : vector<256x128xf32>
    %2 = tpu.matmul %0, %1, %cst {dimension_numbers = #tpu.dot_dimension_numbers<[1], [0], [0], [1], [0, 0, 1, 1], [], []>} : vector<256x48xbf16>, vector<48x128xbf16>, vector<256x128xf32> -> vector<256x128xf32>
    %3 = arith.truncf %2 : vector<256x128xf32> to vector<256x128xbf16>
    %c0_3 = arith.constant 0 : index
    %c0_4 = arith.constant 0 : index
    %4 = vector.load %arg3[%c0_3, %c0_4] : memref<256x128xbf16, #tpu.memory_space<vmem>>, vector<256x128xbf16>
    tpu.vector_store %arg3[%c0_3, %c0_4], %3 {strides = array<i32>} : memref<256x128xbf16, #tpu.memory_space<vmem>>, vector<256x128xbf16>,
    return
  }
  func.func @transform_0(%arg0: i32) -> (i32, i32) {
    %c0_i32 = arith.constant 0 : i32
    %c0_i32_0 = arith.constant 0 : i32
    return %arg0, %c0_i32 : i32, i32
  }
  func.func @transform_1(%arg0: i32) -> (i32, i32) {
    %c0_i32 = arith.constant 0 : i32
    %c0_i32_0 = arith.constant 0 : i32
    %c0_i32_1 = arith.constant 0 : i32
    return %c0_i32, %c0_i32_0 : i32, i32
  }
  func.func @transform_2(%arg0: i32) -> (i32, i32) {
    %c0_i32 = arith.constant 0 : i32
    %c0_i32_0 = arith.constant 0 : i32
    return %arg0, %c0_i32 : i32, i32
  }
}

</mosaic_0001>

<bundles_post_ra>
// kernel: tpu_custom_call.1
= control target key start
LH: loop header
LB: loop body
LE: loop exit
PB: predicated region body
PF: predicated region fallthrough
CT: control target
= control target key end

     0   :  { %7 = vsyncpa [#allocation3], 0  ;;  %s1062_s0 = inlined_call_operand.vmem [shape: bf16[768,48], index: 0, kind: input, shape index: {}]   ;;  %s1063_s1 = inlined_call_operand.vmem [shape: bf16[48,128], index: 1, kind: input, shape index: {}]   ;;  %s1064_s2 = inlined_call_operand.hbm [shape: bf16[768,128], index: 2, kind: output, shape index: {}]  }
   0x1   :  { %9 = vsyncpa [#allocation3 + $0x1], 0  ;;  %s912_s9 = smov 0   ;;  %s914_s10 = smov 0  }
   0x2   :  { %s916_s11 = smov 0   ;;  %s918_s12 = smov 0  }
   0x3 LB: > { %s933_s13 = sadd.s32 4294967295, %s893_s12   ;;  %s562_s14 = sadd.s32 4294967294, %s893_s12   ;;  %s893_s12 = sphi %s918_s12, %s1070_s12   ;;  %s889_s11 = sphi %s916_s11, %s1069_s11   ;;  %s885_s10 = sphi %s914_s10, %s1068_s10   ;;  %s881_s9 = sphi %s912_s9, %s1067_s9  }
   0x4   : > { %s937_s15 = sadd.s32 1, %s893_s12   ;;  %s69_s16 = sadd.s32 1, %s889_s11 }
   0x5   : > { %s66_s17 = ssub.s32 %s893_s12, %s937_s15  ;;  %p79_p0 = scmp.ne.s32.totalorder %s889_s11, %s885_s10 }
   0x6   : > { %p67_p1 = scmp.eq.s32.totalorder %s66_s17, 0  ;;  %p80_p2 = scmp.eq.s32.totalorder %s933_s13, 2 }
   0x7   : > { %p85_p3 = scmp.ne.s32.totalorder %s885_s10, %s881_s9  ;;  %p86_p4 = scmp.eq.s32.totalorder %s562_s14, 2 }
   0x8   : > { %s948_s18 = scalar_select %p67_p1, %s889_s11, %s69_s16  }
   0x9   : > { %p950_p5 = por %p80_p2, %p79_p0  ;;  %p954_p6 = por %p86_p4, %p85_p3 }
   0xa   : > { %p565_p7 = scmp.ge.s32.totalorder %s893_s12, 1  ;;  %p116_p8 = scmp.lt.s32.totalorder %s893_s12, 4 }
   0xc   : > { %p117_p9 = pnand %p565_p7, %p116_p8 }
   0xd   : > { %s567_s23 = sshll.u32 (!%p117_p9), %s933_s13, 5  ;;  %s135_s4 = sand.u32 (!%p117_p9), 1, %s885_s10  }
   0xe   : > { %120 = sbr.rel (%p117_p9) target bundleno = 227 (0xe3), region = 28  ;;  %p139_p10 = scmp.lt.s32.totalorder (!%p117_p9), %s567_s23, 95 }
   0xf   : > { %s566_s5 = sshll.u32 (!%p117_p9), %s135_s4, 7  ;;  %s685_s7 = sshll.u32 (!%p117_p9), %s933_s13, 7 }
  0x10   : > { %s1010_s6 = scalar_lea.vmem (!%p117_p9), [#allocation2], %s566_s5  ;;  %s496_s16 = scalar_lea.hbm (!%p117_p9), %s1064_s2, %s685_s7 }
  0x11   : > { %s497_s17 = sshll.u32 (!%p117_p9), %s1010_s6, 4  ;;  %s499_s21 = sshll.u32 (!%p117_p9), %s496_s16, 4  ;;  %s498_s17 = int_to_ptr.vmem [resolvable:$true] %s497_s17  ;;  %s500_s21 = int_to_ptr.hbm [resolvable:$true] %s499_s21 }
  0x12   : > { %s485_s13 = scalar_lea.sflag (!%p117_p9), [#allocation3], %s135_s4  ;;  %s845_s22 = sshra.s32 (!%p117_p9), %s500_s21, 4  ;;  %s846_s22 = int_to_ptr.hbm [resolvable:$true] %s845_s22 }
  0x13   : > { %v684_v0 = vld [vmem:[%s1063_s1 + $0x10] sm:$0xff]  ;;  %v683_v1 = vld [vmem:[%s1063_s1 + $0x8] sm:$0xff]  ;;  %s1072_s23 = smov (!%p139_p10, %s567_s23), 95  ;;  %v682_v2 = vld [vmem:[%s1063_s1] sm:$0xff]  ;;  %vm282_vm0 = vcmask 392192   ;;  %p852_p0 = scmp.lt.s32.totalorder %s846_s22, %s1064_s2 }
  0x14   : > { %336 = vmatpush.bf16.msra.mxu0 %v684_v0  ;;  %781 = vmatpush.bf16.msra.mxu1 %v684_v0  ;;  %s568_s26 = sshll.u32 %s1072_s23, 2  ;;  %s847_s23 = scalar_lea.hbm %s846_s22, 128 }
  0x15   : > { %782 = vmatpush.bf16.msra.mxu2 %v684_v0  ;;  %783 = vmatpush.bf16.msra.mxu3 %v684_v0  ;;  %s973_s3 = scalar_lea.vmem %s1062_s0, %s568_s26  ;;  %p848_p11 = scmp.ne.s32.totalorder %s846_s22, %s847_s23 }
  0x16   : > { %v666_v3 = vld [vmem:[%s973_s3] sm:$0xff]  ;;  %v667_v7 = vld [vmem:[%s973_s3 + $0x8] sm:$0xff]  ;;  %v668_v11 = vld [vmem:[%s973_s3 + $0x10] sm:$0xff]  ;;  %s851_s26 = scalar_lea.hbm %s1064_s2, 384 }
  0x17   : > { %v670_v4 = vld [vmem:[%s973_s3 + $0x20] sm:$0xff]  ;;  %v671_v8 = vld [vmem:[%s973_s3 + $0x28] sm:$0xff]  ;;  %v672_v12 = vld [vmem:[%s973_s3 + $0x30] sm:$0xff]  ;;  %p849_p12 = pnand %p848_p11, %p950_p5  ;;  %p853_p1 = scmp.lt.s32.totalorder %s851_s26, %s847_s23 }
  0x18   : > { %337 = vmatpush.bf16.msra.mxu0 %v683_v1  ;;  %784 = vmatpush.bf16.msra.mxu1 %v683_v1  ;;  %v674_v5 = vld [vmem:[%s973_s3 + $0x40] sm:$0xff]  ;;  %v675_v9 = vld [vmem:[%s973_s3 + $0x48] sm:$0xff]  ;;  %v676_v13 = vld [vmem:[%s973_s3 + $0x50] sm:$0xff] }
  0x19   : > { %785 = vmatpush.bf16.msra.mxu2 %v683_v1  ;;  %786 = vmatpush.bf16.msra.mxu3 %v683_v1  ;;  %v678_v6 = vld [vmem:[%s973_s3 + $0x60] sm:$0xff]  ;;  %v679_v10 = vld [vmem:[%s973_s3 + $0x68] sm:$0xff]  ;;  %v680_v14 = vld [vmem:[%s973_s3 + $0x70] sm:$0xff]  ;;  %p850_p13 = pneg %p849_p12  ;;  %p854_p2 = por %p853_p1, %p852_p0 }
  0x1a   : > { %v669_v15 = vld [vmem:[%s973_s3 + $0x18] sm:$0xff] }
  0x1b   : > { %v673_v16 = vld [vmem:[%s973_s3 + $0x38] sm:$0xff]  ;;  %p855_p3 = pnand %p854_p2, %p850_p13 }
  0x1c   : > { %338 = vmatpush.bf16.msra.mxu0 %v682_v2  ;;  %787 = vmatpush.bf16.msra.mxu1 %v682_v2  ;;  %v677_v17 = vld [vmem:[%s973_s3 + $0x58] sm:$0xff] }
  0x1d   : > { %788 = vmatpush.bf16.msra.mxu2 %v682_v2  ;;  %789 = vmatpush.bf16.msra.mxu3 %v682_v2  ;;  %v681_v18 = vld [vmem:[%s973_s3 + $0x78] sm:$0xff] }
  0x1f   : > { %645 = vmatmul.msk.bf16.vlgmr.msra.gmra.mxu0 %vm282_vm0, %v666_v3  ;;  %649 = vmatmul.msk.bf16.vlgmr.msra.gmra.mxu1 %vm282_vm0, %v670_v4 }
  0x20   : > { %653 = vmatmul.msk.bf16.vlgmr.msra.gmra.mxu2 %vm282_vm0, %v674_v5  ;;  %657 = vmatmul.msk.bf16.vlgmr.msra.gmra.mxu3 %vm282_vm0, %v678_v6 }
  0x2f   : > { %646 = vmatmul.msk.bf16.gmra.mxu0 %vm282_vm0, %v667_v7  ;;  %650 = vmatmul.msk.bf16.gmra.mxu1 %vm282_vm0, %v671_v8 }
  0x30   : > { %654 = vmatmul.msk.bf16.gmra.mxu2 %vm282_vm0, %v675_v9  ;;  %658 = vmatmul.msk.bf16.gmra.mxu3 %vm282_vm0, %v679_v10 }
  0x3f   : > { %647 = vmatmul.msk.bf16.gmra.mxu0 %vm282_vm0, %v668_v11  ;;  %651 = vmatmul.msk.bf16.gmra.mxu1 %vm282_vm0, %v672_v12 }
  0x40   : > { %655 = vmatmul.msk.bf16.gmra.mxu2 %vm282_vm0, %v676_v13  ;;  %659 = vmatmul.msk.bf16.gmra.mxu3 %vm282_vm0, %v680_v14 }
  0x4f   : > { %648 = vmatmul.msk.bf16.gmra.mxu0 %vm282_vm0, %v669_v15  ;;  %652 = vmatmul.msk.bf16.gmra.mxu1 %vm282_vm0, %v673_v16 }
  0x50   : > { %656 = vmatmul.msk.bf16.gmra.mxu2 %vm282_vm0, %v677_v17  ;;  %660 = vmatmul.msk.bf16.gmra.mxu3 %vm282_vm0, %v681_v18 }
  0x9c   : > { %v340_v19 = vpop.f32.mrf.mxu0  ;;  %v360_v20 = vpop.f32.mrf.mxu1 }
  0xa3   : > { %v380_v21 = vpop.f32.mrf.mxu2  ;;  %v400_v22 = vpop.f32.mrf.mxu3 }
  0xa4   : > { %v342_v23 = vpop.f32.mrf.mxu0  ;;  %v362_v24 = vpop.f32.mrf.mxu1 }
  0xa5   : > { %v689_v25 = vpack.c.bf16 %v342_v23, %v340_v19  ;;  %v709_v26 = vpack.c.bf16 %v362_v24, %v360_v20 }
  0xa7   : > { %690 = vst [vmem:[%s1010_s6] sm:$0xff] %v689_v25  }
  0xa8   : > { %769 = vst [vmem:[%s1010_s6 + $0x20] sm:$0xff] %v709_v26  }
  0xab   : > { %v382_v27 = vpop.f32.mrf.mxu2  ;;  %v402_v28 = vpop.f32.mrf.mxu3 }
  0xac   : > { %v729_v29 = vpack.c.bf16 %v382_v27, %v380_v21  ;;  %v749_v30 = vpack.c.bf16 %v402_v28, %v400_v22  ;;  %v345_v31 = vpop.f32.mrf.mxu0  ;;  %v365_v32 = vpop.f32.mrf.mxu1 }
  0xae   : > { %773 = vst [vmem:[%s1010_s6 + $0x40] sm:$0xff] %v729_v29  }
  0xaf   : > { %777 = vst [vmem:[%s1010_s6 + $0x60] sm:$0xff] %v749_v30  }
  0xb3   : > { %v385_v33 = vpop.f32.mrf.mxu2  ;;  %v405_v34 = vpop.f32.mrf.mxu3 }
  0xb4   : > { %v347_v35 = vpop.f32.mrf.mxu0  ;;  %v367_v36 = vpop.f32.mrf.mxu1 }
  0xb5   : > { %v694_v37 = vpack.c.bf16 %v347_v35, %v345_v31  ;;  %v714_v38 = vpack.c.bf16 %v367_v36, %v365_v32 }
  0xb7   : > { %766 = vst [vmem:[%s1010_s6 + $0x8] sm:$0xff] %v694_v37  }
  0xb8   : > { %770 = vst [vmem:[%s1010_s6 + $0x28] sm:$0xff] %v714_v38  }
  0xbb   : > { %v387_v39 = vpop.f32.mrf.mxu2  ;;  %v407_v40 = vpop.f32.mrf.mxu3 }
  0xbc   : > { %v734_v41 = vpack.c.bf16 %v387_v39, %v385_v33  ;;  %v754_v42 = vpack.c.bf16 %v407_v40, %v405_v34  ;;  %v350_v43 = vpop.f32.mrf.mxu0  ;;  %v370_v44 = vpop.f32.mrf.mxu1 }
  0xbe   : > { %774 = vst [vmem:[%s1010_s6 + $0x48] sm:$0xff] %v734_v41  }
  0xbf   : > { %778 = vst [vmem:[%s1010_s6 + $0x68] sm:$0xff] %v754_v42  }
  0xc3   : > { %v390_v45 = vpop.f32.mrf.mxu2  ;;  %v410_v46 = vpop.f32.mrf.mxu3 }
  0xc4   : > { %v352_v47 = vpop.f32.mrf.mxu0  ;;  %v372_v48 = vpop.f32.mrf.mxu1 }
  0xc5   : > { %v699_v49 = vpack.c.bf16 %v352_v47, %v350_v43  ;;  %v719_v50 = vpack.c.bf16 %v372_v48, %v370_v44 }
  0xc7   : > { %767 = vst [vmem:[%s1010_s6 + $0x10] sm:$0xff] %v699_v49  }
  0xc8   : > { %771 = vst [vmem:[%s1010_s6 + $0x30] sm:$0xff] %v719_v50  }
  0xcb   : > { %v392_v51 = vpop.f32.mrf.mxu2  ;;  %v412_v52 = vpop.f32.mrf.mxu3 }
  0xcc   : > { %v739_v53 = vpack.c.bf16 %v392_v51, %v390_v45  ;;  %v759_v54 = vpack.c.bf16 %v412_v52, %v410_v46  ;;  %v355_v55 = vpop.f32.mrf.mxu0  ;;  %v375_v56 = vpop.f32.mrf.mxu1 }
  0xce   : > { %775 = vst [vmem:[%s1010_s6 + $0x50] sm:$0xff] %v739_v53  }
  0xcf   : > { %779 = vst [vmem:[%s1010_s6 + $0x70] sm:$0xff] %v759_v54  }
  0xd3   : > { %v395_v57 = vpop.f32.mrf.mxu2  ;;  %v415_v58 = vpop.f32.mrf.mxu3 }
  0xd4   : > { %v357_v59 = vpop.f32.mrf.mxu0  ;;  %v377_v60 = vpop.f32.mrf.mxu1 }
  0xd5   : > { %v704_v61 = vpack.c.bf16 %v357_v59, %v355_v55  ;;  %v724_v62 = vpack.c.bf16 %v377_v60, %v375_v56 }
  0xd7   : > { %768 = vst [vmem:[%s1010_s6 + $0x18] sm:$0xff] %v704_v61  }
  0xd8   : > { %772 = vst [vmem:[%s1010_s6 + $0x38] sm:$0xff] %v724_v62  }
  0xdb   : > { %v397_v63 = vpop.f32.mrf.mxu2  ;;  %v417_v0 = vpop.f32.mrf.mxu3 }
  0xdc   : > { %v744_v1 = vpack.c.bf16 %v397_v63, %v395_v57  ;;  %v764_v2 = vpack.c.bf16 %v417_v0, %v415_v58 }
  0xde   : > { %776 = vst [vmem:[%s1010_s6 + $0x58] sm:$0xff] %v744_v1  }
  0xdf   : > { %780 = vst [vmem:[%s1010_s6 + $0x78] sm:$0xff] %v764_v2  }
  0xe0   : > { %858 = shalt.err (!%p855_p3)
}
  0xe1   : > { %s895_s29 = smov 64   ;;  %s896_s30 = smov 4  }
  0xe2   : > { %790 = dma.vmem_to_hbm [thread:$0]  (%p950_p5), %s498_s17, 2048, %s500_s21, %s485_s13, %s895_s29, %s895_s29, %s896_s30  }
  0xe3 PF: > { %p796_p4 = scmp.ge.s32.totalorder %s893_s12, 2  ;;  %s514_s3 = sand.u32 1, %s881_s9  }
  0xe4   : > { %s515_s4 = scalar_lea.sflag [#allocation3], %s514_s3 }
  0xe5   : > { %p793_p7 = pnand %p796_p4, %p954_p6 }
  0xe7   : > { %p794_p8 = pneg %p793_p7 }
  0xe9   : > { %876 = dma.done.wait (%p794_p8), %s515_s4, 2048  }
  0xea   : > { %878 = vsyncadd (%p794_p8), %s515_s4, 4294965248  ;;  %p12_p9 = scmp.ge.s32.totalorder %s937_s15, 5   ;;  %s1067_s9 = smov %s885_s10 }
  0xeb   : > { %s1068_s10 = smov %s889_s11  ;;  %s1069_s11 = smov %s948_s18 }
  0xec   : > { %s1070_s12 = smov %s937_s15  ;;  %14 = sbr.rel (!%p12_p9) target bundleno = 3 (0x3), region = 63 }
  0xf1   :  { %521 = vsyncpa [#allocation3], 1 }
  0xf2   :  { %523 = vsyncpa [#allocation3 + $0x1], 1 }

</bundles_post_ra>
